<compile_context>
chip_gen: v6e
topology: v6e:2x2x1
jax: 0.10.0
libtpu: 0.0.40
codegen_flags: <defaults>
</compile_context>

<pallas_src>
import math
import functools

import jax
import jax.numpy as jnp
from jax import lax
from jax.experimental import pallas as pl
from jax.experimental.pallas import tpu as pltpu

_EPS = 1e-5
_INV_SQRT2 = 1.0 / math.sqrt(2.0)


def _gelu(x):
    # exact (erf-based) GELU, matching torch.nn.GELU default
    return 0.5 * x * (1.0 + lax.erf(x * _INV_SQRT2))


def _dct_matrix(n):
    """Orthonormal DCT-II matrix D ([n, n]); y = x @ D.T along the last dim."""
    k = jnp.arange(n, dtype=jnp.float32)[:, None]
    i = jnp.arange(n, dtype=jnp.float32)[None, :]
    basis = jnp.cos(jnp.pi * (i + 0.5) * k / n)
    scl = jnp.where(k == 0, math.sqrt(1.0 / n), math.sqrt(2.0 / n))
    return scl * basis


def _make_kernel(has_res):
    def kernel(*refs):
        if has_res:
            (x_ref, r_ref, mfc_ref, m2_ref, wd_ref, bd_ref, wu_ref, bu_ref,
             out_ref) = refs
        else:
            (x_ref, mfc_ref, m2_ref, wd_ref, bd_ref, wu_ref, bu_ref,
             out_ref) = refs
        x = x_ref[...].astype(jnp.float32)                     # (TR, FCp)
        xb = x.astype(jnp.bfloat16)
        # per-token mean (block-diagonal group-mean matmul), broadcast on lanes
        mu = jnp.dot(xb, mfc_ref[...], preferred_element_type=jnp.float32)
        d = x - mu                                              # centered, f32
        db = d.astype(jnp.bfloat16)
        # per-token variance, broadcast directly to the F*HID hidden lanes
        var = jnp.dot((d * d).astype(jnp.bfloat16), m2_ref[...],
                      preferred_element_type=jnp.float32)       # (TR, FH)
        # centered x through (gamma * truncated-DCT * freq_down); the LN 1/std
        # is a per-group scalar so it commutes through the block-diagonal
        # projection and is applied afterwards at the narrow FH width.
        t = jnp.dot(db, wd_ref[...], preferred_element_type=jnp.float32)
        h = _gelu(t * lax.rsqrt(var + _EPS) + bd_ref[...])
        # freq_up (adapter scale already folded into the weight/bias)
        o = jnp.dot(h.astype(jnp.bfloat16), wu_ref[...],
                    preferred_element_type=jnp.float32) + bu_ref[...]
        if has_res:
            o = o + r_ref[...].astype(jnp.float32)
        out_ref[...] = o.astype(out_ref.dtype)
    return kernel


@functools.partial(jax.jit, static_argnames=("dct_kernel_size", "block_rows"))
def dct_adapter(x, params, *, dct_kernel_size=3, scale=1.0, residual=None,
                block_rows=1024):
    """x: [B, S, C] -> out: [B, S, C] (matches DCTAdapter.forward)."""
    B, S, C = x.shape
    w_down, b_down = params["w_down"], params["b_down"]     # (HID, keep), (HID,)
    w_up, b_up = params["w_up"], params["b_up"]             # (C, HID),   (C,)
    gamma, beta = params["gamma"], params["beta"]           # (C,), (C,)
    HID = w_down.shape[0]
    keep = max(12, dct_kernel_size)
    assert keep <= C, "in_features must be >= max(12, dct_kernel_size)"

    # ---- batch-invariant folding (under jit, executed once per call) ----
    D = _dct_matrix(C)[:keep]                  # truncated ortho DCT-II (keep, C)
    w_comb = D.T @ w_down.T                    # (C, HID): DCT folded into freq_down
    wd_blk = gamma[:, None] * w_comb           # LN gamma folded into the weight
    bd_blk = b_down + beta @ w_comb            # LN beta folded into the bias
    wu_blk = w_up.T * scale                    # (HID, C): scale folded into freq_up
    bu_blk = b_up * scale

    # ---- lane-dense token folding (never emit sub-128-lane blocks) ----
    if C <= 128:
        Cp = 1 << (C - 1).bit_length()         # next power of two -> divides 128
        F = 128 // Cp
    else:
        Cp = -(-C // 128) * 128                # multiple of 128, F = 1
        F = 1
    # TODO(synk): for very large C (Cp >~ 2048) the (F*Cp)^2 mean matrix stops
    # fitting VMEM comfortably; switch LN stats to an in-kernel reduction there.
    FCp, FH = F * Cp, F * HID
    pad_c = Cp - C

    mfc_blk = jnp.zeros((Cp, Cp), jnp.float32).at[:C, :C].set(1.0 / C)
    m2_blk = jnp.zeros((Cp, HID), jnp.float32).at[:C, :].set(1.0 / C)
    wd_blk_p = jnp.zeros((Cp, HID), jnp.float32).at[:C, :].set(wd_blk)
    wu_blk_p = jnp.zeros((HID, Cp), jnp.float32).at[:, :C].set(wu_blk)
    bu_blk_p = jnp.zeros((Cp,), jnp.float32).at[:C].set(bu_blk)

    eyeF = jnp.eye(F, dtype=jnp.float32)
    Mfc = jnp.kron(eyeF, mfc_blk).astype(jnp.bfloat16)       # (FCp, FCp)
    M2 = jnp.kron(eyeF, m2_blk).astype(jnp.bfloat16)         # (FCp, FH)
    Wd = jnp.kron(eyeF, wd_blk_p).astype(jnp.bfloat16)       # (FCp, FH)
    Wu = jnp.kron(eyeF, wu_blk_p).astype(jnp.bfloat16)       # (FH, FCp)
    bd = jnp.tile(bd_blk, F).reshape(1, FH)                  # f32 biases
    bu = jnp.tile(bu_blk_p, F).reshape(1, FCp)

    # ---- row tiling: pad tokens so every tile is full; >=2 tiles for v7x ----
    N = B * S
    NFr = -(-N // F)                           # folded rows actually needed
    tiles = max(2, -(-NFr // block_rows))
    tiles += tiles % 2                         # even tile count -> 2 TCs busy
    TR = -(-NFr // tiles)
    TR = -(-TR // 8) * 8                       # multiple of 8 sublanes
    NF = TR * tiles
    pad_n = NF * F - N

    x2 = x.reshape(N, C)
    if pad_n or pad_c:
        x2 = jnp.pad(x2, ((0, pad_n), (0, pad_c)))
    xf = x2.reshape(NF, FCp)                   # free (row-major) reshape

    args = [xf]
    if residual is not None:
        r2 = residual.reshape(N, C)
        if pad_n or pad_c:
            r2 = jnp.pad(r2, ((0, pad_n), (0, pad_c)))
        args.append(r2.reshape(NF, FCp))
    args += [Mfc, M2, Wd, bd, Wu, bu]

    def full(shape):
        return pl.BlockSpec(shape, lambda i, _n=len(shape): (0,) * _n)

    row_spec = pl.BlockSpec((TR, FCp), lambda i: (i, 0))
    in_specs = [row_spec]
    if residual is not None:
        in_specs.append(row_spec)
    in_specs += [full((FCp, FCp)), full((FCp, FH)), full((FCp, FH)),
                 full((1, FH)), full((FH, FCp)), full((1, FCp))]

    out = pl.pallas_call(
        _make_kernel(residual is not None),
        out_shape=jax.ShapeDtypeStruct((NF, FCp), x.dtype),
        grid_spec=pltpu.PrefetchScalarGridSpec(
            num_scalar_prefetch=0,
            grid=(tiles,),
            in_specs=in_specs,
            out_specs=row_spec),
        compiler_params=pltpu.CompilerParams(
            dimension_semantics=("parallel",)),
    )(*args)

    out = out.reshape(NF * F, Cp)
    if pad_n or pad_c:
        out = out[:N, :C]
    return out.reshape(B, S, C)


def init_params(key, in_features, hidden, keep=12):
    # NOTE: the PyTorch module zero-initializes freq_up (output exactly 0 at
    # init); small random weights make the correctness check non-trivial.
    ks = jax.random.split(key, 4)
    bd_ = 1.0 / math.sqrt(keep)
    bu_ = 1.0 / math.sqrt(hidden)
    return dict(
        w_down=jax.random.uniform(ks[0], (hidden, keep), jnp.float32, -bd_, bd_),
        b_down=jax.random.uniform(ks[1], (hidden,), jnp.float32, -bd_, bd_),
        w_up=jax.random.uniform(ks[2], (in_features, hidden), jnp.float32, -bu_, bu_),
        b_up=jax.random.uniform(ks[3], (in_features,), jnp.float32, -bu_, bu_),
        gamma=jnp.ones((in_features,), jnp.float32) * 1.1,
        beta=jnp.full((in_features,), 0.05, jnp.float32),
    )


def reference(x, p, *, dct_kernel_size=3, scale=1.0, residual=None):
    # pure-JAX reference of the unfused DCTAdapter forward
    B, S, C = x.shape
    keep = max(12, dct_kernel_size)
    mu = jnp.mean(x, axis=-1, keepdims=True)
    var = jnp.mean(jnp.square(x - mu), axis=-1, keepdims=True)
    xn = (x - mu) * lax.rsqrt(var + _EPS) * p["gamma"] + p["beta"]
    D = _dct_matrix(C)
    dctf = jnp.einsum("bsc,kc->bsk", xn, D)[..., :keep]   # dct(norm='ortho') + slice
    h = _gelu(dctf @ p["w_down"].T + p["b_down"])
    o = (h @ p["w_up"].T + p["b_up"]) * scale
    if residual is not None:
        o = o + residual
    return o


if __name__ == "__main__":
    # in_features must be >= 12 (the module slices 12 DCT freqs into Linear(12, hid))
    B, S, C = 2, 128, 32                 # batch=2, seq=128, in_features=32
    HID = int(C * 0.25)                  # mlp_ratio=0.25 -> hidden=8
    key = jax.random.PRNGKey(0)
    kx, kp, kr = jax.random.split(key, 3)
    x = jax.random.normal(kx, (B, S, C), jnp.float32) + 0.3   # nonzero-mean tokens
    params = init_params(kp, C, HID)

    # no residual
    out = jax.block_until_ready(dct_adapter(x, params))
    assert out.shape == (B, S, C)
    ref = reference(x, params)
    err1 = float(jnp.max(jnp.abs(out - ref)))
    assert err1 < 2e-2, f"max abs err (no residual) {err1}"

    # fused residual path
    res = jax.random.normal(kr, (B, S, C), jnp.float32)
    out_r = jax.block_until_ready(dct_adapter(x, params, residual=res))
    ref_r = reference(x, params, residual=res)
    err2 = float(jnp.max(jnp.abs(out_r - ref_r)))
    assert err2 < 2e-2, f"max abs err (residual) {err2}"

    print("KERNEL_OK")
</pallas_src>

<mosaic_0001>
module attributes {stable_mosaic.version = 11 : i64} {
  func.func @kernel(%arg0: i32, %arg1: memref<32x128xf32, #tpu.memory_space<vmem>>, %arg2: memref<128x128xbf16, #tpu.memory_space<vmem>>, %arg3: memref<128x32xbf16, #tpu.memory_space<vmem>>, %arg4: memref<128x32xbf16, #tpu.memory_space<vmem>>, %arg5: memref<1x32xf32, #tpu.memory_space<vmem>>, %arg6: memref<32x128xbf16, #tpu.memory_space<vmem>>, %arg7: memref<1x128xf32, #tpu.memory_space<vmem>>, %arg8: memref<32x128xf32, #tpu.memory_space<vmem>>) attributes {dimension_semantics = [#tpu.dimension_semantics<parallel>], iteration_bounds = array<i64: 2>, scalar_prefetch = 0 : i64, scratch_operands = 0 : i64, tpu.core_type = #tpu.core_type<tc>, window_params = [{transform_indices = @transform_0, window_bounds = array<i64: 32, 128>}, {pipeline_mode = #tpu.pipeline_mode<synchronous>, transform_indices = @transform_1, window_bounds = array<i64: 128, 128>}, {pipeline_mode = #tpu.pipeline_mode<synchronous>, transform_indices = @transform_2, window_bounds = array<i64: 128, 32>}, {pipeline_mode = #tpu.pipeline_mode<synchronous>, transform_indices = @transform_3, window_bounds = array<i64: 128, 32>}, {pipeline_mode = #tpu.pipeline_mode<synchronous>, transform_indices = @transform_4, window_bounds = array<i64: 1, 32>}, {pipeline_mode = #tpu.pipeline_mode<synchronous>, transform_indices = @transform_5, window_bounds = array<i64: 32, 128>}, {pipeline_mode = #tpu.pipeline_mode<synchronous>, transform_indices = @transform_6, window_bounds = array<i64: 1, 128>}, {transform_indices = @transform_7, window_bounds = array<i64: 32, 128>}]} {
    %c0 = arith.constant 0 : index
    %c0_0 = arith.constant 0 : index
    %0 = vector.load %arg1[%c0, %c0_0] : memref<32x128xf32, #tpu.memory_space<vmem>>, vector<32x128xf32>
    %1 = arith.truncf %0 : vector<32x128xf32> to vector<32x128xbf16>
    %c0_1 = arith.constant 0 : index
    %c0_2 = arith.constant 0 : index
    %2 = vector.load %arg2[%c0_1, %c0_2] : memref<128x128xbf16, #tpu.memory_space<vmem>>, vector<128x128xbf16>
    %cst = arith.constant dense<0.000000e+00> : vector<32x128xf32>
    %3 = tpu.matmul %1, %2, %cst {dimension_numbers = #tpu.dot_dimension_numbers<[1], [0], [0], [1], [0, 0, 1, 1], [], []>} : vector<32x128xbf16>, vector<128x128xbf16>, vector<32x128xf32> -> vector<32x128xf32>
    %4 = arith.subf %0, %3 : vector<32x128xf32>
    %5 = arith.truncf %4 : vector<32x128xf32> to vector<32x128xbf16>
    %6 = arith.mulf %4, %4 : vector<32x128xf32>
    %7 = arith.truncf %6 : vector<32x128xf32> to vector<32x128xbf16>
    %c0_3 = arith.constant 0 : index
    %c0_4 = arith.constant 0 : index
    %8 = vector.load %arg3[%c0_3, %c0_4] : memref<128x32xbf16, #tpu.memory_space<vmem>>, vector<128x32xbf16>
    %cst_5 = arith.constant dense<0.000000e+00> : vector<32x32xf32>
    %9 = tpu.matmul %7, %8, %cst_5 {dimension_numbers = #tpu.dot_dimension_numbers<[1], [0], [0], [1], [0, 0, 1, 1], [], []>} : vector<32x128xbf16>, vector<128x32xbf16>, vector<32x32xf32> -> vector<32x32xf32>
    %c0_6 = arith.constant 0 : index
    %c0_7 = arith.constant 0 : index
    %10 = vector.load %arg4[%c0_6, %c0_7] : memref<128x32xbf16, #tpu.memory_space<vmem>>, vector<128x32xbf16>
    %cst_8 = arith.constant dense<0.000000e+00> : vector<32x32xf32>
    %11 = tpu.matmul %5, %10, %cst_8 {dimension_numbers = #tpu.dot_dimension_numbers<[1], [0], [0], [1], [0, 0, 1, 1], [], []>} : vector<32x128xbf16>, vector<128x32xbf16>, vector<32x32xf32> -> vector<32x32xf32>
    %cst_9 = arith.constant 9.99999974E-6 : f32
    %12 = vector.broadcast %cst_9 : f32 to vector<32x32xf32>
    %13 = arith.addf %9, %12 : vector<32x32xf32>
    %14 = math.rsqrt %13 : vector<32x32xf32>
    %15 = arith.mulf %11, %14 : vector<32x32xf32>
    %c0_10 = arith.constant 0 : index
    %c0_11 = arith.constant 0 : index
    %16 = vector.load %arg5[%c0_10, %c0_11] : memref<1x32xf32, #tpu.memory_space<vmem>>, vector<1x32xf32>
    %17 = vector.broadcast %16 : vector<1x32xf32> to vector<32x32xf32>
    %18 = arith.addf %15, %17 : vector<32x32xf32>
    %cst_12 = arith.constant 5.000000e-01 : f32
    %19 = vector.broadcast %cst_12 : f32 to vector<32x32xf32>
    %20 = arith.mulf %19, %18 : vector<32x32xf32>
    %cst_13 = arith.constant 0.707106769 : f32
    %21 = vector.broadcast %cst_13 : f32 to vector<32x32xf32>
    %22 = arith.mulf %18, %21 : vector<32x32xf32>
    %23 = math.erf %22 : vector<32x32xf32>
    %cst_14 = arith.constant 1.000000e+00 : f32
    %24 = vector.broadcast %cst_14 : f32 to vector<32x32xf32>
    %25 = arith.addf %24, %23 : vector<32x32xf32>
    %26 = arith.mulf %20, %25 : vector<32x32xf32>
    %27 = arith.truncf %26 : vector<32x32xf32> to vector<32x32xbf16>
    %c0_15 = arith.constant 0 : index
    %c0_16 = arith.constant 0 : index
    %28 = vector.load %arg6[%c0_15, %c0_16] : memref<32x128xbf16, #tpu.memory_space<vmem>>, vector<32x128xbf16>
    %cst_17 = arith.constant dense<0.000000e+00> : vector<32x128xf32>
    %29 = tpu.matmul %27, %28, %cst_17 {dimension_numbers = #tpu.dot_dimension_numbers<[1], [0], [0], [1], [0, 0, 1, 1], [], []>} : vector<32x32xbf16>, vector<32x128xbf16>, vector<32x128xf32> -> vector<32x128xf32>
    %c0_18 = arith.constant 0 : index
    %c0_19 = arith.constant 0 : index
    %30 = vector.load %arg7[%c0_18, %c0_19] : memref<1x128xf32, #tpu.memory_space<vmem>>, vector<1x128xf32>
    %31 = vector.broadcast %30 : vector<1x128xf32> to vector<32x128xf32>
    %32 = arith.addf %29, %31 : vector<32x128xf32>
    %c0_20 = arith.constant 0 : index
    %c0_21 = arith.constant 0 : index
    %33 = vector.load %arg8[%c0_20, %c0_21] : memref<32x128xf32, #tpu.memory_space<vmem>>, vector<32x128xf32>
    tpu.vector_store %arg8[%c0_20, %c0_21], %32 {strides = array<i32>} : memref<32x128xf32, #tpu.memory_space<vmem>>, vector<32x128xf32>,
    return
  }
  func.func @transform_0(%arg0: i32) -> (i32, i32) {
    %c0_i32 = arith.constant 0 : i32
    %c0_i32_0 = arith.constant 0 : i32
    return %arg0, %c0_i32 : i32, i32
  }
  func.func @transform_1(%arg0: i32) -> (i32, i32) {
    %c0_i32 = arith.constant 0 : i32
    %c0_i32_0 = arith.constant 0 : i32
    %c0_i32_1 = arith.constant 0 : i32
    return %c0_i32, %c0_i32_0 : i32, i32
  }
  func.func @transform_2(%arg0: i32) -> (i32, i32) {
    %c0_i32 = arith.constant 0 : i32
    %c0_i32_0 = arith.constant 0 : i32
    %c0_i32_1 = arith.constant 0 : i32
    return %c0_i32, %c0_i32_0 : i32, i32
  }
  func.func @transform_3(%arg0: i32) -> (i32, i32) {
    %c0_i32 = arith.constant 0 : i32
    %c0_i32_0 = arith.constant 0 : i32
    %c0_i32_1 = arith.constant 0 : i32
    return %c0_i32, %c0_i32_0 : i32, i32
  }
  func.func @transform_4(%arg0: i32) -> (i32, i32) {
    %c0_i32 = arith.constant 0 : i32
    %c0_i32_0 = arith.constant 0 : i32
    %c0_i32_1 = arith.constant 0 : i32
    return %c0_i32, %c0_i32_0 : i32, i32
  }
  func.func @transform_5(%arg0: i32) -> (i32, i32) {
    %c0_i32 = arith.constant 0 : i32
    %c0_i32_0 = arith.constant 0 : i32
    %c0_i32_1 = arith.constant 0 : i32
    return %c0_i32, %c0_i32_0 : i32, i32
  }
  func.func @transform_6(%arg0: i32) -> (i32, i32) {
    %c0_i32 = arith.constant 0 : i32
    %c0_i32_0 = arith.constant 0 : i32
    %c0_i32_1 = arith.constant 0 : i32
    return %c0_i32, %c0_i32_0 : i32, i32
  }
  func.func @transform_7(%arg0: i32) -> (i32, i32) {
    %c0_i32 = arith.constant 0 : i32
    %c0_i32_0 = arith.constant 0 : i32
    return %arg0, %c0_i32 : i32, i32
  }
}

</mosaic_0001>

<bundles_post_ra>
// kernel: tile.13
= control target key start
LH: loop header
LB: loop body
LE: loop exit
PB: predicated region body
PF: predicated region fallthrough
CT: control target
= control target key end

     0   :  { %s22_s0 = inlined_call_operand.vmem [shape: f32[8], index: 0, kind: input, shape index: {}]   ;;  %s23_s1 = inlined_call_operand.vmem [shape: f32[4,8], index: 1, kind: output, shape index: {}]  }
   0x1   :  { %v4_v0 = vld [vmem:[%s22_s0] ss:$0 sm:$0xff] }
   0x2   :  { %5 = vst [vmem:[%s23_s1] sm:$0xf] %v4_v0 }

// kernel: tile.14
= control target key start
LH: loop header
LB: loop body
LE: loop exit
PB: predicated region body
PF: predicated region fallthrough
CT: control target
= control target key end

     0   :  { %vm8_vm0 = vcmask 64512   ;;  %s40_s8 = smov 8   ;;  %s41_s9 = smov 16   ;;  %vm14_vm1 = vcmask 261312   ;;  %vm20_vm2 = vcmask 195712   ;;  %vm26_vm3 = vcmask 130112   ;;  %s58_s0 = inlined_call_operand.vmem [shape: f32[4,8], index: 0, kind: input, shape index: {}]   ;;  %s59_s1 = inlined_call_operand.vmem [shape: f32[1,32], index: 1, kind: output, shape index: {}]  }
   0x1   :  { %v5_v0 = vld [vmem:[%s58_s0] sm:$0xf]  ;;  %s39_s0 = smov 24  }
   0x2   :  { %6 = vst [vmem:[#allocation1] sm:$0xf] %v5_v0 }
   0x9   :  { %v11_v1 = vld [vmem:[#allocation1 + $0x3] sm:$0x1]   ;;  %v23_v2 = vld [vmem:[#allocation1 + $0x1] sm:$0x1]   ;;  %v7_v3 = vld [vmem:[#allocation1] sm:$0x1]  }
   0xa   :  { %12 = vrot.lane.b32.xlu0 %v11_v1, %s39_s0  ;;  %24 = vrot.lane.b32.xlu1 %v23_v2, %s40_s8  ;;  %v17_v4 = vld [vmem:[#allocation1 + $0x2] sm:$0x1]   ;;  %9 = vst.msk [vmem:[#allocation0] sm:$0x1] %vm8_vm0, %v7_v3  }
   0xe   :  { %18 = vrot.lane.b32.xlu0 %v17_v4, %s41_s9 }
  0x7c   :  { %v13_v5 = vpop.permute.xlu0 %12   ;;  %v25_v6 = vpop.permute.xlu1 %24  }
  0x7d   :  { %15 = vst.msk [vmem:[#allocation0] sm:$0x1] %vm14_vm1, %v13_v5  }
  0x80   :  { %v19_v7 = vpop.permute.xlu0 %18  }
  0x81   :  { %21 = vst.msk [vmem:[#allocation0] sm:$0x1] %vm20_vm2, %v19_v7  }
  0x82   :  { %27 = vst.msk [vmem:[#allocation0] sm:$0x1] %vm26_vm3, %v25_v6  }
  0x89   :  { %v32_v8 = vld [vmem:[#allocation0] sm:$0x1] }
  0x8a   :  { %35 = vst [vmem:[%s59_s1] sm:$0x1] %v32_v8 }

// kernel: tile.18
= control target key start
LH: loop header
LB: loop body
LE: loop exit
PB: predicated region body
PF: predicated region fallthrough
CT: control target
= control target key end

     0   :  { %s22_s0 = inlined_call_operand.vmem [shape: f32[32], index: 0, kind: input, shape index: {}]   ;;  %s23_s1 = inlined_call_operand.vmem [shape: f32[4,32], index: 1, kind: output, shape index: {}]  }
   0x1   :  { %v4_v0 = vld [vmem:[%s22_s0] ss:$0 sm:$0xff] }
   0x2   :  { %5 = vst [vmem:[%s23_s1] sm:$0xf] %v4_v0 }

// kernel: tile.19
= control target key start
LH: loop header
LB: loop body
LE: loop exit
PB: predicated region body
PF: predicated region fallthrough
CT: control target
= control target key end

     0   :  { %vm8_vm0 = vcmask 261120   ;;  %s40_s8 = smov 32   ;;  %s41_s9 = smov 64   ;;  %vm14_vm1 = vcmask 1048320   ;;  %vm20_vm2 = vcmask 785920   ;;  %vm26_vm3 = vcmask 523520   ;;  %s58_s0 = inlined_call_operand.vmem [shape: f32[4,32], index: 0, kind: input, shape index: {}]   ;;  %s59_s1 = inlined_call_operand.vmem [shape: f32[1,128], index: 1, kind: output, shape index: {}]  }
   0x1   :  { %v5_v0 = vld [vmem:[%s58_s0] sm:$0xf]  ;;  %s39_s0 = smov 96  }
   0x2   :  { %6 = vst [vmem:[#allocation1] sm:$0xf] %v5_v0 }
   0x9   :  { %v11_v1 = vld [vmem:[#allocation1 + $0x3] sm:$0x1]   ;;  %v23_v2 = vld [vmem:[#allocation1 + $0x1] sm:$0x1]   ;;  %v7_v3 = vld [vmem:[#allocation1] sm:$0x1]  }
   0xa   :  { %12 = vrot.lane.b32.xlu0 %v11_v1, %s39_s0  ;;  %24 = vrot.lane.b32.xlu1 %v23_v2, %s40_s8  ;;  %v17_v4 = vld [vmem:[#allocation1 + $0x2] sm:$0x1]   ;;  %9 = vst.msk [vmem:[#allocation0] sm:$0x1] %vm8_vm0, %v7_v3  }
   0xe   :  { %18 = vrot.lane.b32.xlu0 %v17_v4, %s41_s9 }
  0x7c   :  { %v13_v5 = vpop.permute.xlu0 %12   ;;  %v25_v6 = vpop.permute.xlu1 %24  }
  0x7d   :  { %15 = vst.msk [vmem:[#allocation0] sm:$0x1] %vm14_vm1, %v13_v5  }
  0x80   :  { %v19_v7 = vpop.permute.xlu0 %18  }
  0x81   :  { %21 = vst.msk [vmem:[#allocation0] sm:$0x1] %vm20_vm2, %v19_v7  }
  0x82   :  { %27 = vst.msk [vmem:[#allocation0] sm:$0x1] %vm26_vm3, %v25_v6  }
  0x89   :  { %v32_v8 = vld [vmem:[#allocation0] sm:$0x1] }
  0x8a   :  { %35 = vst [vmem:[%s59_s1] sm:$0x1] %v32_v8 }

// kernel: dct_adapter.1
= control target key start
LH: loop header
LB: loop body
LE: loop exit
PB: predicated region body
PF: predicated region fallthrough
CT: control target
= control target key end

     0   :  { %s1061_s24 = smov 0   ;;  %s1183_s0 = inlined_call_operand.vmem [shape: f32[64,128], index: 0, kind: input, shape index: {}]   ;;  %s1184_s1 = inlined_call_operand.vmem [shape: bf16[128,128], index: 1, kind: input, shape index: {}]   ;;  %s1185_s2 = inlined_call_operand.vmem [shape: bf16[128,32], index: 2, kind: input, shape index: {}]   ;;  %s1186_s3 = inlined_call_operand.vmem [shape: bf16[128,32], index: 3, kind: input, shape index: {}]   ;;  %s1187_s4 = inlined_call_operand.vmem [shape: f32[1,32], index: 4, kind: input, shape index: {}]   ;;  %s1188_s5 = inlined_call_operand.vmem [shape: bf16[32,128], index: 5, kind: input, shape index: {}]   ;;  %s1189_s6 = inlined_call_operand.vmem [shape: f32[1,128], index: 6, kind: input, shape index: {}]   ;;  %s1190_s7 = inlined_call_operand.vmem [shape: f32[64,128], index: 7, kind: output, shape index: {}]  }
   0x1 LB: > { %s820_s25 = sadd.s32 4294967295, %s1019_s24   ;;  %p824_p0 = scmp.ge.s32.totalorder %s1019_s24, 1  ;;  %s1019_s24 = sphi %s1061_s24, %s17_s24  }
   0x2   : > { %p238_p1 = scmp.lt.s32.totalorder %s1019_s24, 3 }
   0x4   : > { %p239_p2 = pnand %p824_p0, %p238_p1 }
   0x5   : > { %s825_s28 = sshll.u32 (!%p239_p2), %s820_s25, 2 }
   0x6   : > { %242 = sbr.rel (%p239_p2) target bundleno = 694 (0x2b6), region = 48  ;;  %p271_p3 = scmp.lt.s32.totalorder (!%p239_p2), %s825_s28, 7 }
   0xb   : > { %v971_v0 = vld [vmem:[%s1184_s1 + $0x38] sm:$0xff]   ;;  %v972_v1 = vld [vmem:[%s1184_s1 + $0x30] sm:$0xff]   ;;  %s1192_s28 = smov (!%p271_p3, %s825_s28), 7  ;;  %v973_v2 = vld [vmem:[%s1184_s1 + $0x28] sm:$0xff]   ;;  %vm704_vm0 = vcmask 261120  }
   0xc   : > { %895 = vmatprep.subr.bf16.mxu0 %v971_v0  ;;  %s826_s10 = sshll.u32 %s1192_s28, 3  ;;  %v974_v3 = vld [vmem:[%s1184_s1 + $0x20] sm:$0xff]   ;;  %v979_v7 = vld [vmem:[%s1186_s3 + $0x38] sm:$0xff]   ;;  %v981_v9 = vld [vmem:[%s1186_s3 + $0x30] sm:$0xff]  }
   0xd   : > { %896 = vmatpush3.bf16.msra.mxu0 %v971_v0  ;;  %s1086_s13 = scalar_lea.vmem %s1183_s0, %s826_s10  ;;  %v975_v8 = vld [vmem:[%s1184_s1 + $0x18] sm:$0xff]   ;;  %915 = vmatprep.subr.bf16.mxu1 %v979_v7  ;;  %v983_v10 = vld [vmem:[%s1186_s3 + $0x28] sm:$0xff]   ;;  %v976_v11 = vld [vmem:[%s1184_s1 + $0x10] sm:$0xff]   ;;  %s280_s27 = scalar_lea.vmem %s1190_s7, %s826_s10 }
   0xe   : > { %897 = vmatprep.subr.bf16.mxu0 %v972_v1  ;;  %v1092_v4 = vld [vmem:[%s1086_s13] sm:$0xff]  ;;  %v1095_v5 = vld [vmem:[%s1086_s13 + $0x8] sm:$0xff]  ;;  %916 = vmatpush3.bf16.msra.mxu1 %v979_v7  ;;  %v987_v14 = vld [vmem:[%s1186_s3 + $0x18] sm:$0xff]  }
   0xf   : > { %v287_v6 = vpack.c.bf16 %v1095_v5, %v1092_v4  ;;  %917 = vmatprep.subr.bf16.mxu1 %v981_v9  ;;  %v985_v12 = vld [vmem:[%s1186_s3 + $0x20] sm:$0xff]   ;;  %v977_v13 = vld [vmem:[%s1184_s1 + $0x8] sm:$0xff]   ;;  %v285_v16 = vld [vmem:[%s1086_s13 + $0x10] sm:$0xff] }
  0x10   : > { %v978_v15 = vld [vmem:[%s1184_s1] sm:$0xff]   ;;  %v286_v17 = vld [vmem:[%s1086_s13 + $0x18] sm:$0xff]  ;;  %v982_v20 = vld [vmem:[%s1185_s2 + $0x30] sm:$0xff]  }
  0x11   : > { %898 = vmatpush3.bf16.msra.mxu0 %v972_v1  ;;  %911 = vmatprep.mubr.bf16.mxu0 %v287_v6  ;;  %v980_v18 = vld [vmem:[%s1185_s2 + $0x38] sm:$0xff]   ;;  %v288_v19 = vpack.c.bf16 %v286_v17, %v285_v16  ;;  %v984_v21 = vld [vmem:[%s1185_s2 + $0x28] sm:$0xff]   ;;  %v986_v22 = vld [vmem:[%s1185_s2 + $0x20] sm:$0xff]  }
  0x12   : > { %899 = vmatprep.subr.bf16.mxu0 %v973_v2  ;;  %918 = vmatpush3.bf16.msra.mxu1 %v981_v9  ;;  %v988_v23 = vld [vmem:[%s1185_s2 + $0x18] sm:$0xff]   ;;  %v989_v24 = vld [vmem:[%s1186_s3 + $0x10] sm:$0xff]   ;;  %v991_v26 = vld [vmem:[%s1186_s3 + $0x8] sm:$0xff]  }
  0x13   : > { %919 = vmatprep.subr.bf16.mxu1 %v983_v10  ;;  %v990_v25 = vld [vmem:[%s1185_s2 + $0x10] sm:$0xff]   ;;  %v992_v27 = vld [vmem:[%s1185_s2 + $0x8] sm:$0xff]   ;;  %v993_v28 = vld [vmem:[%s1186_s3] sm:$0xff]  }
  0x14   : > { %v994_v29 = vld [vmem:[%s1185_s2] sm:$0xff]   ;;  %v995_v46 = vld [vmem:[%s1188_s5 + $0x8] sm:$0xff]  }
  0x15   : > { %900 = vmatpush3.bf16.msra.mxu0 %v973_v2  ;;  %v996_v47 = vld [vmem:[%s1188_s5] sm:$0xff]  }
  0x16   : > { %901 = vmatprep.subr.bf16.mxu0 %v974_v3  ;;  %920 = vmatpush3.bf16.msra.mxu1 %v983_v10  ;;  %v853_v59 = vld [vmem:[%s1187_s4] ss:$0 sm:$0xff] }
  0x17   : > { %921 = vmatprep.subr.bf16.mxu1 %v985_v12 }
  0x19   : > { %902 = vmatpush3.bf16.msra.mxu0 %v974_v3 }
  0x1a   : > { %903 = vmatprep.subr.bf16.mxu0 %v975_v8  ;;  %922 = vmatpush3.bf16.msra.mxu1 %v985_v12 }
  0x1b   : > { %923 = vmatprep.subr.bf16.mxu1 %v987_v14 }
  0x1d   : > { %904 = vmatpush3.bf16.msra.mxu0 %v975_v8 }
  0x1e   : > { %905 = vmatprep.subr.bf16.mxu0 %v976_v11  ;;  %924 = vmatpush3.bf16.msra.mxu1 %v987_v14 }
  0x1f   : > { %925 = vmatprep.subr.bf16.mxu1 %v989_v24 }
  0x21   : > { %906 = vmatpush3.bf16.msra.mxu0 %v976_v11 }
  0x22   : > { %907 = vmatprep.subr.bf16.mxu0 %v977_v13  ;;  %926 = vmatpush3.bf16.msra.mxu1 %v989_v24 }
  0x23   : > { %927 = vmatprep.subr.bf16.mxu1 %v991_v26 }
  0x25   : > { %908 = vmatpush3.bf16.msra.mxu0 %v977_v13 }
  0x26   : > { %909 = vmatprep.subr.bf16.mxu0 %v978_v15  ;;  %928 = vmatpush3.bf16.msra.mxu1 %v991_v26 }
  0x27   : > { %929 = vmatprep.subr.bf16.mxu1 %v993_v28 }
  0x29   : > { %910 = vmatpush3.bf16.msra.mxu0 %v978_v15 }
  0x2a   : > { %935 = vmatprep.subr.bf16.mxu0 %v980_v18  ;;  %930 = vmatpush3.bf16.msra.mxu1 %v993_v28 }
  0x2b   : > { %955 = vmatprep.subr.bf16.mxu1 %v995_v46 }
  0x2c   : > { %912 = vmatmul.mubr.bf16.vlgmr.msra.gmra.mxu0 %v288_v19 }
  0x2d   : > { %936 = vmatpush3.bf16.msra.mxu0 %v980_v18 }
  0x2e   : > { %937 = vmatprep.subr.bf16.mxu0 %v982_v20 }
  0x31   : > { %938 = vmatpush3.bf16.msra.mxu0 %v982_v20 }
  0x32   : > { %939 = vmatprep.subr.bf16.mxu0 %v984_v21 }
  0x35   : > { %940 = vmatpush3.bf16.msra.mxu0 %v984_v21 }
  0x36   : > { %941 = vmatprep.subr.bf16.mxu0 %v986_v22 }
  0x39   : > { %942 = vmatpush3.bf16.msra.mxu0 %v986_v22 }
  0x3a   : > { %943 = vmatprep.subr.bf16.mxu0 %v988_v23 }
  0x3d   : > { %944 = vmatpush3.bf16.msra.mxu0 %v988_v23 }
  0x3e   : > { %945 = vmatprep.subr.bf16.mxu0 %v990_v25 }
  0x41   : > { %946 = vmatpush3.bf16.msra.mxu0 %v990_v25 }
  0x42   : > { %947 = vmatprep.subr.bf16.mxu0 %v992_v27 }
  0x45   : > { %948 = vmatpush3.bf16.msra.mxu0 %v992_v27 }
  0x46   : > { %949 = vmatprep.subr.bf16.mxu0 %v994_v29 }
  0x49   : > { %950 = vmatpush3.bf16.msra.mxu0 %v994_v29 }
  0xec   : > { %v913_v30 = vpop.f32.mrf.mxu0 }
  0xed   : > { %v404_v35 = vsub.f32 %v285_v16, %v913_v30 }
  0xee   : > { %v387_v31 = vpop.f32.mrf.mxu0 }
  0xef   : > { %v402_v33 = vsub.f32 %v1092_v4, %v387_v31  ;;  %v410_v42 = vmul.f32 %v404_v35, %v404_v35 }
  0xf0   : > { %v914_v32 = vpop.f32.mrf.mxu0 }
  0xf1   : > { %v405_v34 = vsub.f32 %v286_v17, %v914_v32  ;;  %v408_v39 = vmul.f32 %v402_v33, %v402_v33  ;;  %v854_v32 = vld [vmem:[%s1189_s6] ss:$0 sm:$0xff] }
  0xf2   : > { %v390_v36 = vpop.f32.mrf.mxu0 }
  0xf3   : > { %v403_v37 = vsub.f32 %v1095_v5, %v390_v36  ;;  %v411_v38 = vmul.f32 %v405_v34, %v405_v34  ;;  %v407_v43 = vpack.c.bf16 %v405_v34, %v404_v35 }
  0xf5   : > { %v409_v40 = vmul.f32 %v403_v37, %v403_v37  ;;  %v406_v41 = vpack.c.bf16 %v403_v37, %v402_v33  ;;  %v413_v45 = vpack.c.bf16 %v411_v38, %v410_v42 }
  0xf7   : > { %931 = vmatprep.mubr.bf16.mxu1 %v406_v41  ;;  %v412_v44 = vpack.c.bf16 %v409_v40, %v408_v39 }
  0xf8   : > { %932 = vmatmul.mubr.bf16.vlgmr.msra.gmra.mxu1 %v407_v43 }
  0xf9   : > { %951 = vmatprep.mubr.bf16.mxu0 %v412_v44  ;;  %956 = vmatpush3.bf16.msra.mxu1 %v995_v46 }
  0xfa   : > { %952 = vmatmul.mubr.bf16.vlgmr.msra.gmra.mxu0 %v413_v45  ;;  %957 = vmatprep.subr.bf16.mxu1 %v996_v47 }
  0xfd   : > { %958 = vmatpush3.bf16.msra.mxu1 %v996_v47 }
 0x1b8   : > { %v933_v56 = vpop.f32.mrf.mxu1 }
 0x1ba   : > { %v953_v48 = vpop.f32.mrf.mxu0  ;;  %v528_v57 = vpop.f32.mrf.mxu1 }
 0x1bb   : > { %v634_v49 = vadd.f32 1e-05, %v953_v48 }
 0x1bc   : > { %v625_v50 = vpop.f32.mrf.mxu0  ;;  %v934_v62 = vpop.f32.mrf.mxu1 }
 0x1bd   : > { %997 = vrsqrt.f32 %v634_v49  ;;  %v626_v51 = vadd.f32 1e-05, %v625_v50 }
 0x1be   : > { %v954_v52 = vpop.f32.mrf.mxu0  ;;  %v531_v6 = vpop.f32.mrf.mxu1 }
 0x1bf   : > { %999 = vrsqrt.f32 %v626_v51  ;;  %v637_v53 = vadd.f32 1e-05, %v954_v52 }
 0x1c0   : > { %v628_v54 = vpop.f32.mrf.mxu0 }
 0x1c1   : > { %1001 = vrsqrt.f32 %v637_v53  ;;  %v629_v55 = vadd.f32 1e-05, %v628_v54 }
 0x1c3   : > { %1003 = vrsqrt.f32 %v629_v55 }
 0x1ca   : > { %v998_v58 = vpop.eup %997 }
 0x1cb   : > { %v646_v60 = vmul.f32 %v998_v58, %v933_v56 }
 0x1cc   : > { %v1000_v61 = vpop.eup %999 }
 0x1cd   : > { %v657_v63 = vadd.f32 %v853_v59, %v646_v60  ;;  %v644_v0 = vmul.f32 %v1000_v61, %v528_v57 }
 0x1ce   : > { %v1002_v1 = vpop.eup %1001 }
 0x1cf   : > { %v647_v2 = vmul.f32 %v1002_v1, %v934_v62  ;;  %v655_v3 = vadd.f32 %v853_v59, %v644_v0  ;;  %v665_v5 = vmul.f32 0.70710677, %v657_v63  ;;  %v661_v24 = vmul.f32 0.5, %v657_v63 }
 0x1d0   : > { %v1004_v4 = vpop.eup %1003 }
 0x1d1   : > { %v658_v7 = vadd.f32 %v853_v59, %v647_v2  ;;  %v645_v8 = vmul.f32 %v1004_v4, %v531_v6  ;;  %v663_v9 = vmul.f32 0.70710677, %v655_v3  ;;  %v659_v21 = vmul.f32 0.5, %v655_v3 }
 0x1d3   : > { %v666_v10 = vmul.f32 0.70710677, %v658_v7  ;;  %v656_v11 = vadd.f32 %v853_v59, %v645_v8  ;;  %1005 = verf.f32 %v663_v9  ;;  %v662_v19 = vmul.f32 0.5, %v658_v7 }
 0x1d4   : > { %1007 = verf.f32 %v665_v5 }
 0x1d5   : > { %v664_v12 = vmul.f32 0.70710677, %v656_v11  ;;  %1009 = verf.f32 %v666_v10  ;;  %v660_v22 = vmul.f32 0.5, %v656_v11 }
 0x1d7   : > { %1011 = verf.f32 %v664_v12 }
 0x1e0   : > { %v1006_v13 = vpop.eup %1005 }
 0x1e1   : > { %v1008_v14 = vpop.eup %1007  ;;  %v671_v16 = vadd.f32 1.0, %v1006_v13 }
 0x1e2   : > { %v1010_v15 = vpop.eup %1009  ;;  %v673_v20 = vadd.f32 1.0, %v1008_v14 }
 0x1e3   : > { %v674_v17 = vadd.f32 1.0, %v1010_v15  ;;  %v675_v26 = vmul.f32 %v671_v16, %v659_v21 }
 0x1e4   : > { %v1012_v18 = vpop.eup %1011  ;;  %v677_v28 = vmul.f32 %v673_v20, %v661_v24 }
 0x1e5   : > { %v672_v23 = vadd.f32 1.0, %v1012_v18  ;;  %v678_v25 = vmul.f32 %v674_v17, %v662_v19 }
 0x1e7   : > { %v676_v27 = vmul.f32 %v672_v23, %v660_v22  ;;  %v680_v30 = vpack.c.bf16 %v678_v25, %v677_v28 }
 0x1e9   : > { %v679_v29 = vpack.c.bf16 %v676_v27, %v675_v26 }
 0x1eb   : > { %959 = vmatprep.mubr.msk.bf16.mxu1 %vm704_vm0, %v679_v29 }
 0x1ec   : > { %960 = vmatmul.mubr.msk.bf16.vlgmr.msra.gmra.mxu1 %vm704_vm0, %v680_v30 }
 0x2ac   : > { %v961_v31 = vpop.f32.mrf.mxu1 }
 0x2ad   : > { %v754_v38 = vadd.f32 %v961_v31, %v854_v32 }
 0x2ae   : > { %v745_v33 = vpop.f32.mrf.mxu1 }
 0x2af   : > { %v746_v34 = vadd.f32 %v854_v32, %v745_v33  ;;  %762 = vst [vmem:[%s280_s27 + $0x10] sm:$0xff] %v754_v38 }
 0x2b0   : > { %v962_v35 = vpop.f32.mrf.mxu1 }
 0x2b1   : > { %760 = vst [vmem:[%s280_s27] sm:$0xff] %v746_v34  ;;  %v757_v39 = vadd.f32 %v962_v35, %v854_v32 }
 0x2b2   : > { %v748_v36 = vpop.f32.mrf.mxu1 }
 0x2b3   : > { %v749_v37 = vadd.f32 %v854_v32, %v748_v36  ;;  %763 = vst [vmem:[%s280_s27 + $0x18] sm:$0xff] %v757_v39 }
 0x2b5   : > { %761 = vst [vmem:[%s280_s27 + $0x8] sm:$0xff] %v749_v37 }
 0x2b6 PF: > { %s17_s24 = sadd.s32 1, %s1019_s24  }
 0x2b7   : > { %p14_p4 = scmp.ge.s32.totalorder %s17_s24, 4  }
 0x2b9   :  { %16 = sbr.rel (!%p14_p4) target bundleno = 1 (0x1), region = 78 }

</bundles_post_ra>
